<compile_context>
chip_gen: v7x
topology: tpu7x:2x2x1
jax: 0.10.0
libtpu: 0.0.40
codegen_flags: <defaults>
</compile_context>

<pallas_src>
import functools

import jax
import jax.numpy as jnp
from jax.experimental import pallas as pl
from jax.experimental.pallas import tpu as pltpu


def _round_up(x, m):
    return (x + m - 1) // m * m


def _tv_kernel(x_ref, part_ref, *, W, HW_pad):
    """One B*C tile: sublane partial sums of squared W- and H-neighbour diffs.

    x_ref:    (TB, HW_pad)  input tile (any float dtype)
    part_ref: (2,  HW_pad)  row 0 = per-lane sum_b (x[c+1]-x[c])^2
                            row 1 = per-lane sum_b (x[c+W]-x[c])^2
    Wrapped / cross-row / padded lanes are NOT masked here; the wrapper masks
    them post-reduction (identical result, less per-element VALU work).
    """
    # TODO(synk): on v6e/v7x with bf16 inputs, keep the roll+subtract in bf16
    # and upcast only the diff before square+accumulate (half the vreg/vld
    # pressure); kept all-f32 here so the same kernel is safe on v5e.
    x2 = x_ref[...].astype(jnp.float32)  # (TB, HW_pad)

    def roll_left(v, k):
        # y[:, c] = v[:, (c + k) % HW_pad]  (static lane rotation, XLU)
        k = k % HW_pad
        if k == 0:
            return v
        return pltpu.roll(v, shift=HW_pad - k, axis=1)

    dw = roll_left(x2, 1) - x2   # width-direction neighbour diff
    dh = roll_left(x2, W) - x2   # height-direction neighbour diff

    # Sublane/batch-axis reduction only (VPU adds); the per-lane masking and
    # the cross-lane collapse happen once in the wrapper epilogue.
    part_ref[...] = jnp.concatenate(
        [jnp.sum(dw * dw, axis=0, keepdims=True),
         jnp.sum(dh * dh, axis=0, keepdims=True)],
        axis=0,
    )


def make_tv_loss(tv_loss_weight: float = 1.0):
    """Returns a callable computing the TVLoss forward pass for NCHW input."""

    # --- per-generation VMEM budget (queried once, eagerly) ----------------
    try:
        vmem_cap = int(pltpu.get_tpu_info().vmem_capacity_bytes)
    except Exception:  # be conservative if the query is unavailable
        vmem_cap = 64 * 1024 * 1024
    if vmem_cap >= 128 * 1024 * 1024:          # v5e / v6e (128 MiB VMEM)
        vmem_limit_bytes = 64 * 1024 * 1024
        block_budget_bytes = 40 * 1024 * 1024  # input double-buffer + f32 temps
    else:                                       # v7x (64 MiB per TensorCore)
        vmem_limit_bytes = 40 * 1024 * 1024
        block_budget_bytes = 20 * 1024 * 1024

    def tv_loss(x):
        B, C, H, W = x.shape
        BC = B * C
        HW = H * W

        # PyTorch semantics (H==1 or W==1 divides by zero, same as reference).
        count_h = C * (H - 1) * W
        count_w = C * H * (W - 1)

        # Lane-dense layout: contiguous reshape (no copy), then pad the lane
        # axis to a multiple of 128 so pltpu.roll is always legal.
        HW_pad = _round_up(HW, 128)
        xr = x.reshape(BC, HW)

        # ---- tile size along B*C (multiple of 8 sublanes, VMEM-budgeted) ---
        # Per-row footprint: 2x double-buffered input + ~3 full-width f32 temps
        # (upcast, rolled copy, squared diff).
        per_row_bytes = 2 * xr.dtype.itemsize * HW_pad + 12 * HW_pad
        TB = max(8, (block_budget_bytes // per_row_bytes) // 8 * 8)
        TB = min(TB, _round_up(BC, 8))
        # TODO(synk): very large H*W (a single (8, HW_pad) f32 temp exceeding
        # the VMEM budget, e.g. 1080p images) additionally needs H*W-axis
        # tiling with a one-row (W-element) halo and an in-kernel scalar
        # reduction; hits v7x's 64 MiB ceiling first.

        BC_pad = _round_up(BC, TB)
        if BC_pad != BC or HW_pad != HW:
            # Zero rows/lanes contribute exactly zero to both partial sums.
            xr = jnp.pad(xr, ((0, BC_pad - BC), (0, HW_pad - HW)))
        num_blocks = BC_pad // TB

        kernel = functools.partial(_tv_kernel, W=W, HW_pad=HW_pad)

        parts = pl.pallas_call(
            kernel,
            grid=(num_blocks,),
            in_specs=[pl.BlockSpec((TB, HW_pad), lambda i: (i, 0))],
            out_specs=pl.BlockSpec((None, 2, HW_pad), lambda i: (i, 0, 0)),
            out_shape=jax.ShapeDtypeStruct((num_blocks, 2, HW_pad), jnp.float32),
            compiler_params=pltpu.CompilerParams(
                # Data-parallel over B*C tiles.
                # TODO(synk): on v7x, consider pltpu.CORE_PARALLEL (or an
                # explicit core_map) to guarantee the grid shards across both
                # TensorCores; "parallel" is a no-op on 1-TC chips.
                dimension_semantics=("parallel",),
                vmem_limit_bytes=vmem_limit_bytes,
            ),
            cost_estimate=pl.CostEstimate(
                flops=6 * BC_pad * HW_pad,
                transcendentals=0,
                bytes_accessed=BC_pad * HW_pad * xr.dtype.itemsize
                + num_blocks * 2 * HW_pad * 4,
            ),
        )(xr)

        # ---- tiny epilogue: sum blocks, mask wrapped/padded lanes, scale ---
        col = jnp.arange(HW_pad, dtype=jnp.int32)
        w_mask = ((col % W != (W - 1)) & (col < HW)).astype(jnp.float32)
        h_mask = (col < (H - 1) * W).astype(jnp.float32)

        lane_sums = jnp.sum(parts, axis=0)          # (2, HW_pad)
        w_tv = jnp.sum(lane_sums[0] * w_mask)
        h_tv = jnp.sum(lane_sums[1] * h_mask)
        return tv_loss_weight * 2.0 * (h_tv / count_h + w_tv / count_w) / B

    return tv_loss


def tv_loss_reference(x, tv_loss_weight=1.0):
    """Plain-JAX reference mirroring the PyTorch forward exactly."""
    B, C, H, W = x.shape
    count_h = C * (H - 1) * W
    count_w = C * H * (W - 1)
    h_tv = jnp.sum((x[:, :, 1:, :] - x[:, :, : H - 1, :]) ** 2)
    w_tv = jnp.sum((x[:, :, :, 1:] - x[:, :, :, : W - 1]) ** 2)
    return tv_loss_weight * 2.0 * (h_tv / count_h + w_tv / count_w) / B


if __name__ == "__main__":
    key = jax.random.PRNGKey(0)
    tv_loss = jax.jit(make_tv_loss(tv_loss_weight=1.0))

    # Case 1: H*W already a multiple of 128 (pure roll path).
    x1 = jax.random.normal(key, (2, 4, 16, 16), dtype=jnp.float32)
    out1 = jax.block_until_ready(tv_loss(x1))
    ref1 = jax.block_until_ready(tv_loss_reference(x1, 1.0))
    assert jnp.allclose(out1, ref1, rtol=1e-5, atol=1e-5), (out1, ref1)

    # Case 2: H*W not a multiple of 128 and B*C not a multiple of 8
    # (exercises both lane padding and row padding).
    key2 = jax.random.PRNGKey(0)
    x2 = jax.random.normal(key2, (2, 3, 12, 20), dtype=jnp.float32)
    out2 = jax.block_until_ready(tv_loss(x2))
    ref2 = jax.block_until_ready(tv_loss_reference(x2, 1.0))
    assert jnp.allclose(out2, ref2, rtol=1e-5, atol=1e-5), (out2, ref2)

    print("KERNEL_OK")
</pallas_src>

<mosaic_0001>
module attributes {stable_mosaic.version = 11 : i64} {
  func.func @_tv_kernel(%arg0: i32, %arg1: memref<8x256xf32, #tpu.memory_space<vmem>>, %arg2: memref<1x2x256xf32, #tpu.memory_space<vmem>>) attributes {dimension_semantics = [#tpu.dimension_semantics<parallel>], iteration_bounds = array<i64: 1>, scalar_prefetch = 0 : i64, scratch_operands = 0 : i64, tpu.core_type = #tpu.core_type<tc>, window_params = [{transform_indices = @transform_0, window_bounds = array<i64: 8, 256>}, {transform_indices = @transform_1, window_bounds = array<i64: 1, 2, 256>}]} {
    %c0 = arith.constant 0 : index
    %c0_0 = arith.constant 0 : index
    %0 = vector.load %arg1[%c0, %c0_0] : memref<8x256xf32, #tpu.memory_space<vmem>>, vector<8x256xf32>
    %c255_i32 = arith.constant 255 : i32
    %1 = tpu.dynamic_rotate %0 by %c255_i32 dim 1 : vector<8x256xf32>, i32 -> vector<8x256xf32>
    %2 = arith.subf %1, %0 : vector<8x256xf32>
    %c240_i32 = arith.constant 240 : i32
    %3 = tpu.dynamic_rotate %0 by %c240_i32 dim 1 : vector<8x256xf32>, i32 -> vector<8x256xf32>
    %4 = arith.subf %3, %0 : vector<8x256xf32>
    %5 = arith.mulf %2, %2 : vector<8x256xf32>
    %cst = arith.constant dense<0.000000e+00> : vector<256xf32>
    %6 = vector.multi_reduction <add>, %5, %cst [0] : vector<8x256xf32> to vector<256xf32>
    %7 = vector.shape_cast %6 : vector<256xf32> to vector<1x256xf32>
    %8 = arith.mulf %4, %4 : vector<8x256xf32>
    %cst_1 = arith.constant dense<0.000000e+00> : vector<256xf32>
    %9 = vector.multi_reduction <add>, %8, %cst_1 [0] : vector<8x256xf32> to vector<256xf32>
    %10 = vector.shape_cast %9 : vector<256xf32> to vector<1x256xf32>
    %11 = tpu.concatenate %7, %10 in 0 : vector<1x256xf32>, vector<1x256xf32> -> vector<2x256xf32>
    %c0_2 = arith.constant 0 : index
    %c0_3 = arith.constant 0 : index
    %c0_4 = arith.constant 0 : index
    %12 = vector.load %arg2[%c0_2, %c0_3, %c0_4] : memref<1x2x256xf32, #tpu.memory_space<vmem>>, vector<1x2x256xf32>
    %13 = vector.shape_cast %12 : vector<1x2x256xf32> to vector<2x256xf32>
    %14 = vector.shape_cast %11 : vector<2x256xf32> to vector<1x2x256xf32>
    tpu.vector_store %arg2[%c0_2, %c0_3, %c0_4], %14 {strides = array<i32>} : memref<1x2x256xf32, #tpu.memory_space<vmem>>, vector<1x2x256xf32>,
    return
  }
  func.func @transform_0(%arg0: i32) -> (i32, i32) {
    %c0_i32 = arith.constant 0 : i32
    %c0_i32_0 = arith.constant 0 : i32
    return %arg0, %c0_i32 : i32, i32
  }
  func.func @transform_1(%arg0: i32) -> (i32, i32, i32) {
    %c0_i32 = arith.constant 0 : i32
    %c0_i32_0 = arith.constant 0 : i32
    %c0_i32_1 = arith.constant 0 : i32
    return %arg0, %c0_i32, %c0_i32_0 : i32, i32, i32
  }
}

</mosaic_0001>

<bundles_post_ra>
// kernel: tv_loss.1
= control target key start
LH: loop header
LB: loop body
LE: loop exit
PB: predicated region body
PF: predicated region fallthrough
CT: control target
= control target key end

     0   :  { %s80_s8 = smov 112   ;;  %s81_s9 = smov 127   ;;  %v14_v2 = vlaneseq  ;;  %vm58_vm2 = vcmask 1040384   ;;  %s101_s0 = inlined_call_operand.vmem [shape: f32[8,256], index: 0, kind: input, shape index: {}]   ;;  %s102_s1 = inlined_call_operand.vmem [shape: f32[1,2,256], index: 1, kind: output, shape index: {}]  }
   0x1   :  { %v8_v0 = vld [vmem:[%s101_s0] sm:$0xff]  ;;  %v9_v1 = vld [vmem:[%s101_s0 + $0x8] sm:$0xff] }
   0x2   :  { %21 = vrot.lane.b32.xlu1 %v8_v0, %s80_s8  ;;  %10 = vrot.lane.b32.xlu0 %v8_v0, %s81_s9  ;;  %v15_v3 = vand.u32 127, %v14_v2 }
   0x4   :  { %vm25_vm0 = vcmp.lt.s32.totalorder %v15_v3, 112  ;;  %vm16_vm1 = vcmp.lt.s32.totalorder %v15_v3, 127 }
   0x6   :  { %23 = vrot.lane.b32.xlu1 %v9_v1, %s80_s8  ;;  %12 = vrot.lane.b32.xlu0 %v9_v1, %s81_s9 }
  0x74   :  { %v22_v4 = vpop.permute.xlu1 %21  ;;  %v11_v5 = vpop.permute.xlu0 %10 }
  0x78   :  { %v24_v6 = vpop.permute.xlu1 %23  ;;  %v13_v7 = vpop.permute.xlu0 %12 }
  0x79   :  { %v26_v8 = vsel %vm25_vm0, %v22_v4, %v24_v6  ;;  %v27_v9 = vsel %vm25_vm0, %v24_v6, %v22_v4  ;;  %v17_v10 = vsel %vm16_vm1, %v11_v5, %v13_v7  ;;  %v18_v11 = vsel %vm16_vm1, %v13_v7, %v11_v5 }
  0x7a   :  { %v28_v12 = vsub.f32 %v26_v8, %v8_v0  ;;  %v29_v13 = vsub.f32 %v27_v9, %v9_v1  ;;  %v19_v14 = vsub.f32 %v17_v10, %v8_v0  ;;  %v20_v15 = vsub.f32 %v18_v11, %v9_v1 }
  0x7c   :  { %v44_v16 = vmul.f32 %v28_v12, %v28_v12  ;;  %v45_v17 = vmul.f32 %v29_v13, %v29_v13  ;;  %v30_v18 = vmul.f32 %v19_v14, %v19_v14  ;;  %v31_v19 = vmul.f32 %v20_v15, %v20_v15 }
  0x7e   :  { %v46_v20 = vrot.slane %v44_v16, 4  ;;  %v52_v21 = vrot.slane %v45_v17, 4  ;;  %v32_v22 = vrot.slane %v30_v18, 4  ;;  %v38_v23 = vrot.slane %v31_v19, 4 }
  0x80   :  { %v47_v24 = vadd.f32 %v46_v20, %v44_v16  ;;  %v53_v25 = vadd.f32 %v52_v21, %v45_v17  ;;  %v33_v26 = vadd.f32 %v32_v22, %v30_v18  ;;  %v39_v27 = vadd.f32 %v38_v23, %v31_v19 }
  0x82   :  { %v48_v28 = vrot.slane %v47_v24, 2  ;;  %v54_v29 = vrot.slane %v53_v25, 2  ;;  %v34_v30 = vrot.slane %v33_v26, 2  ;;  %v40_v31 = vrot.slane %v39_v27, 2 }
  0x84   :  { %v49_v32 = vadd.f32 %v48_v28, %v47_v24  ;;  %v55_v33 = vadd.f32 %v54_v29, %v53_v25  ;;  %v35_v34 = vadd.f32 %v34_v30, %v33_v26  ;;  %v41_v35 = vadd.f32 %v40_v31, %v39_v27 }
  0x86   :  { %v50_v36 = vrot.slane %v49_v32, 1  ;;  %v56_v37 = vrot.slane %v55_v33, 1  ;;  %v36_v38 = vrot.slane %v35_v34, 1  ;;  %v42_v39 = vrot.slane %v41_v35, 1 }
  0x88   :  { %v51_v40 = vadd.f32 %v50_v36, %v49_v32  ;;  %v57_v41 = vadd.f32 %v56_v37, %v55_v33  ;;  %v37_v42 = vadd.f32 %v36_v38, %v35_v34  ;;  %v43_v43 = vadd.f32 %v42_v39, %v41_v35 }
  0x8a   :  { %v59_v44 = vsel %vm58_vm2, %v37_v42, %v51_v40  ;;  %v60_v45 = vsel %vm58_vm2, %v43_v43, %v57_v41 }
  0x8b   :  { %v63_v46 = vcombine.low %v59_v44, %v60_v45 }
  0x8d   :  { %77 = vst.sshfl [vmem:[%s102_s1] sm:$0x33 pattern:$0x76325410] %v63_v46 }

</bundles_post_ra>
